<compile_context>
chip_gen: v6e
topology: v6e:2x2x1
jax: 0.10.0
libtpu: 0.0.40
codegen_flags: <defaults>
</compile_context>

<pallas_src>
import jax
import jax.numpy as jnp
from jax.experimental import pallas as pl
from jax.experimental.pallas import tpu as pltpu


def hallucination_kernel(x_ref, w1_ref, b1_ref, w2_ref, b2_ref, o_ref):
    # Cast the streamed x tile to bf16 in-kernel (free under DMA).
    x_bf = x_ref[...].astype(jnp.bfloat16)
    # Layer 1: bf16 operands on the MXU, f32 accumulate; fused bias+ReLU+cast
    # epilogue keeps only the bf16 hidden tile live for layer 2.
    h = jnp.dot(x_bf, w1_ref[...], preferred_element_type=jnp.float32)
    h_bf = jnp.maximum(h + b1_ref[...], 0.0).astype(jnp.bfloat16)   # (TILE_B, H)
    # Layer 2: bf16 hidden (intentional precision choice) x bf16 weights,
    # f32 accumulate; bias + ReLU in f32.
    o = jnp.dot(h_bf, w2_ref[...], preferred_element_type=jnp.float32)
    o_ref[...] = jnp.maximum(o + b2_ref[...], 0.0).astype(o_ref.dtype)


def _round_up(x, m):
    return ((x + m - 1) // m) * m


def pick_tile_b(B, *, granule=128, max_tile=1024):
    """Batch tile: 128-multiple, as large as possible while keeping >= 2 grid
    steps for big batches (v7x megacore); single full-coverage step for small
    batches so per-step pipeline overhead is paid once."""
    if B < 2 * granule:
        return granule if B <= granule else _round_up(B, granule)
    half = _round_up(pl.cdiv(B, 2), granule)
    return min(max_tile, half)


def prepare_params(w1, b1, w2, b2):
    """One-time parameter cast (do NOT repeat per forward call):
    weights -> bf16 MXU operands, biases -> f32 rows (1, features)."""
    return (w1.astype(jnp.bfloat16),
            b1.astype(jnp.float32).reshape(1, -1),
            w2.astype(jnp.bfloat16),
            b2.astype(jnp.float32).reshape(1, -1))


def hallucination_net(x, w1_bf, b1_f32, w2_bf, b2_f32, *, tile_b=None,
                      max_tile_b=1024):
    """fake = ReLU(ReLU(x @ w1 + b1) @ w2 + b2).

    x: (B, C_in) in its native dtype (cast to bf16 in-kernel),
    w1_bf: (C_in, H) bf16, b1_f32: (1, H) f32,
    w2_bf: (H, C_out) bf16, b2_f32: (1, C_out) f32 (use prepare_params once).
    Returns (B, C_out) float32.
    """
    B, C_in = x.shape
    H = w1_bf.shape[1]
    C_out = w2_bf.shape[1]

    if tile_b is None:
        tile_b = pick_tile_b(B, max_tile=max_tile_b)
    grid = (int(pl.cdiv(B, tile_b)),)   # ragged last block handled by masking

    flops = 2 * B * (C_in * H + H * C_out)
    bytes_accessed = (x.size * x.dtype.itemsize
                      + w1_bf.size * 2 + w2_bf.size * 2
                      + b1_f32.size * 4 + b2_f32.size * 4
                      + B * C_out * 4)

    out = pl.pallas_call(
        hallucination_kernel,
        out_shape=jax.ShapeDtypeStruct((B, C_out), jnp.float32),
        grid=grid,
        in_specs=[
            # x streams over the batch axis, double-buffered by the pipeline.
            pl.BlockSpec((tile_b, C_in), lambda i: (i, 0)),
            # Weights / biases: constant block index -> fetched once, VMEM-resident.
            pl.BlockSpec((C_in, H), lambda i: (0, 0)),
            pl.BlockSpec((1, H), lambda i: (0, 0)),
            pl.BlockSpec((H, C_out), lambda i: (0, 0)),
            pl.BlockSpec((1, C_out), lambda i: (0, 0)),
        ],
        out_specs=pl.BlockSpec((tile_b, C_out), lambda i: (i, 0)),
        compiler_params=pltpu.CompilerParams(
            dimension_semantics=("parallel",)),
        cost_estimate=pl.CostEstimate(
            flops=flops, transcendentals=0, bytes_accessed=bytes_accessed),
    )(x, w1_bf, b1_f32, w2_bf, b2_f32)

    return out


def reference(x, w1, b1, w2, b2):
    # Precision-matched reference (bf16 operands, f32 accumulation).
    xb, w1b, w2b = (a.astype(jnp.bfloat16) for a in (x, w1, w2))
    b1r = b1.astype(jnp.float32).reshape(1, -1)
    b2r = b2.astype(jnp.float32).reshape(1, -1)
    h = jnp.maximum(jnp.dot(xb, w1b, preferred_element_type=jnp.float32) + b1r, 0.0)
    o = jnp.maximum(jnp.dot(h.astype(jnp.bfloat16), w2b,
                            preferred_element_type=jnp.float32) + b2r, 0.0)
    return o


if __name__ == "__main__":
    # Small shapes consistent with the module (in_channels -> hidden -> out_channels,
    # keeping the 2:1:1 ratio of the defaults 1024 -> 512 -> 512).
    C_IN, HIDDEN, C_OUT = 256, 128, 128

    key = jax.random.PRNGKey(0)
    kx, k1, k2, k3, k4, kx2 = jax.random.split(key, 6)

    # Deterministic parameter init (synthetic; no checkpoint load).
    w1 = jax.random.normal(k1, (C_IN, HIDDEN), dtype=jnp.float32) * 0.02
    b1 = jax.random.normal(k2, (1, HIDDEN), dtype=jnp.float32) * 0.01
    w2 = jax.random.normal(k3, (HIDDEN, C_OUT), dtype=jnp.float32) * 0.02
    b2 = jax.random.normal(k4, (1, C_OUT), dtype=jnp.float32) * 0.01
    params = prepare_params(w1, b1, w2, b2)   # cast once, reuse every call

    # Case 1: B=200 (not a tile multiple) -> single-step small-batch path,
    # ragged block masked by Pallas.
    B1 = 200
    x1 = jax.random.normal(kx, (B1, C_IN), dtype=jnp.float32)
    out1 = jax.block_until_ready(hallucination_net(x1, *params))
    ref1 = reference(x1, w1, b1, w2, b2)
    assert out1.shape == (B1, C_OUT) and out1.dtype == jnp.float32
    assert jnp.allclose(out1, ref1, atol=2e-3, rtol=2e-3), \
        float(jnp.max(jnp.abs(out1 - ref1)))

    # Case 2: B=1000 -> two grid steps (v7x megacore path) with a ragged tail.
    B2 = 1000
    x2 = jax.random.normal(kx2, (B2, C_IN), dtype=jnp.float32)
    out2 = jax.block_until_ready(hallucination_net(x2, *params))
    ref2 = reference(x2, w1, b1, w2, b2)
    assert out2.shape == (B2, C_OUT) and out2.dtype == jnp.float32
    assert jnp.allclose(out2, ref2, atol=2e-3, rtol=2e-3), \
        float(jnp.max(jnp.abs(out2 - ref2)))

    print("KERNEL_OK")
</pallas_src>

<mosaic_0001>
module attributes {stable_mosaic.version = 11 : i64} {
  func.func @hallucination_kernel(%arg0: i32, %arg1: memref<256x256xf32, #tpu.memory_space<vmem>>, %arg2: memref<256x128xbf16, #tpu.memory_space<vmem>>, %arg3: memref<1x128xf32, #tpu.memory_space<vmem>>, %arg4: memref<128x128xbf16, #tpu.memory_space<vmem>>, %arg5: memref<1x128xf32, #tpu.memory_space<vmem>>, %arg6: memref<256x128xf32, #tpu.memory_space<vmem>>) attributes {dimension_semantics = [#tpu.dimension_semantics<parallel>], iteration_bounds = array<i64: 1>, scalar_prefetch = 0 : i64, scratch_operands = 0 : i64, tpu.core_type = #tpu.core_type<tc>, window_params = [{transform_indices = @transform_0, window_bounds = array<i64: 256, 256>}, {pipeline_mode = #tpu.pipeline_mode<synchronous>, transform_indices = @transform_1, window_bounds = array<i64: 256, 128>}, {pipeline_mode = #tpu.pipeline_mode<synchronous>, transform_indices = @transform_2, window_bounds = array<i64: 1, 128>}, {pipeline_mode = #tpu.pipeline_mode<synchronous>, transform_indices = @transform_3, window_bounds = array<i64: 128, 128>}, {pipeline_mode = #tpu.pipeline_mode<synchronous>, transform_indices = @transform_4, window_bounds = array<i64: 1, 128>}, {transform_indices = @transform_5, window_bounds = array<i64: 256, 128>}]} {
    %c0 = arith.constant 0 : index
    %c0_0 = arith.constant 0 : index
    %0 = vector.load %arg1[%c0, %c0_0] : memref<256x256xf32, #tpu.memory_space<vmem>>, vector<256x256xf32>
    %1 = arith.truncf %0 : vector<256x256xf32> to vector<256x256xbf16>
    %c0_1 = arith.constant 0 : index
    %c0_2 = arith.constant 0 : index
    %2 = vector.load %arg2[%c0_1, %c0_2] : memref<256x128xbf16, #tpu.memory_space<vmem>>, vector<256x128xbf16>
    %cst = arith.constant dense<0.000000e+00> : vector<256x128xf32>
    %3 = tpu.matmul %1, %2, %cst {dimension_numbers = #tpu.dot_dimension_numbers<[1], [0], [0], [1], [0, 0, 1, 1], [], []>} : vector<256x256xbf16>, vector<256x128xbf16>, vector<256x128xf32> -> vector<256x128xf32>
    %c0_3 = arith.constant 0 : index
    %c0_4 = arith.constant 0 : index
    %4 = vector.load %arg3[%c0_3, %c0_4] : memref<1x128xf32, #tpu.memory_space<vmem>>, vector<1x128xf32>
    %5 = vector.broadcast %4 : vector<1x128xf32> to vector<256x128xf32>
    %6 = arith.addf %3, %5 : vector<256x128xf32>
    %cst_5 = arith.constant 0.000000e+00 : f32
    %7 = vector.broadcast %cst_5 : f32 to vector<256x128xf32>
    %8 = arith.maximumf %6, %7 : vector<256x128xf32>
    %9 = arith.truncf %8 : vector<256x128xf32> to vector<256x128xbf16>
    %c0_6 = arith.constant 0 : index
    %c0_7 = arith.constant 0 : index
    %10 = vector.load %arg4[%c0_6, %c0_7] : memref<128x128xbf16, #tpu.memory_space<vmem>>, vector<128x128xbf16>
    %cst_8 = arith.constant dense<0.000000e+00> : vector<256x128xf32>
    %11 = tpu.matmul %9, %10, %cst_8 {dimension_numbers = #tpu.dot_dimension_numbers<[1], [0], [0], [1], [0, 0, 1, 1], [], []>} : vector<256x128xbf16>, vector<128x128xbf16>, vector<256x128xf32> -> vector<256x128xf32>
    %c0_9 = arith.constant 0 : index
    %c0_10 = arith.constant 0 : index
    %12 = vector.load %arg5[%c0_9, %c0_10] : memref<1x128xf32, #tpu.memory_space<vmem>>, vector<1x128xf32>
    %13 = vector.broadcast %12 : vector<1x128xf32> to vector<256x128xf32>
    %14 = arith.addf %11, %13 : vector<256x128xf32>
    %cst_11 = arith.constant 0.000000e+00 : f32
    %15 = vector.broadcast %cst_11 : f32 to vector<256x128xf32>
    %16 = arith.maximumf %14, %15 : vector<256x128xf32>
    %c0_12 = arith.constant 0 : index
    %c0_13 = arith.constant 0 : index
    %17 = vector.load %arg6[%c0_12, %c0_13] : memref<256x128xf32, #tpu.memory_space<vmem>>, vector<256x128xf32>
    tpu.vector_store %arg6[%c0_12, %c0_13], %16 {strides = array<i32>} : memref<256x128xf32, #tpu.memory_space<vmem>>, vector<256x128xf32>,
    return
  }
  func.func @transform_0(%arg0: i32) -> (i32, i32) {
    %c0_i32 = arith.constant 0 : i32
    %c0_i32_0 = arith.constant 0 : i32
    return %arg0, %c0_i32 : i32, i32
  }
  func.func @transform_1(%arg0: i32) -> (i32, i32) {
    %c0_i32 = arith.constant 0 : i32
    %c0_i32_0 = arith.constant 0 : i32
    %c0_i32_1 = arith.constant 0 : i32
    return %c0_i32, %c0_i32_0 : i32, i32
  }
  func.func @transform_2(%arg0: i32) -> (i32, i32) {
    %c0_i32 = arith.constant 0 : i32
    %c0_i32_0 = arith.constant 0 : i32
    %c0_i32_1 = arith.constant 0 : i32
    return %c0_i32, %c0_i32_0 : i32, i32
  }
  func.func @transform_3(%arg0: i32) -> (i32, i32) {
    %c0_i32 = arith.constant 0 : i32
    %c0_i32_0 = arith.constant 0 : i32
    %c0_i32_1 = arith.constant 0 : i32
    return %c0_i32, %c0_i32_0 : i32, i32
  }
  func.func @transform_4(%arg0: i32) -> (i32, i32) {
    %c0_i32 = arith.constant 0 : i32
    %c0_i32_0 = arith.constant 0 : i32
    %c0_i32_1 = arith.constant 0 : i32
    return %c0_i32, %c0_i32_0 : i32, i32
  }
  func.func @transform_5(%arg0: i32) -> (i32, i32) {
    %c0_i32 = arith.constant 0 : i32
    %c0_i32_0 = arith.constant 0 : i32
    return %arg0, %c0_i32 : i32, i32
  }
}

</mosaic_0001>

<bundles_post_ra>
// kernel: tpu_custom_call.1
= control target key start
LH: loop header
LB: loop body
LE: loop exit
PB: predicated region body
PF: predicated region fallthrough
CT: control target
= control target key end

     0   :  { %10 = vsyncpa [#allocation3], 0  ;;  %s1313_s0 = inlined_call_operand.hbm [shape: f32[200,256], index: 0, kind: input, shape index: {}]   ;;  %s1314_s1 = inlined_call_operand.hbm [shape: bf16[256,128], index: 1, kind: input, shape index: {}]   ;;  %s1315_s2 = inlined_call_operand.vmem [shape: f32[1,128], index: 2, kind: input, shape index: {}]   ;;  %s1316_s3 = inlined_call_operand.hbm [shape: bf16[128,128], index: 3, kind: input, shape index: {}]   ;;  %s1317_s4 = inlined_call_operand.vmem [shape: f32[1,128], index: 4, kind: input, shape index: {}]   ;;  %s1318_s5 = inlined_call_operand.hbm [shape: f32[200,128], index: 5, kind: output, shape index: {}]  }
   0x1   :  { %11 = vsyncpa [#allocation6], 0 }
   0x2   :  { %12 = vsyncpa [#allocation4], 0 }
   0x3   :  { %17 = vsyncadd [#allocation3], 1792  ;;  %s1163_s18 = smov [#allocation5]  }
   0x4   :  { %s30_s19 = sshll.u32 %s1163_s18, 4  ;;  %s31_s19 = int_to_ptr.vmem [resolvable:$true] %s30_s19 }
   0x5   :  { %s1085_s20 = scalar_lea.vmem %s31_s19, 2048  ;;  %p1090_p1 = scmp.lt.s32.totalorder %s31_s19, %s31_s19 }
   0x6   :  { %p1086_p0 = scmp.ne.s32.totalorder %s31_s19, %s1085_s20  ;;  %p1091_p2 = scmp.lt.s32.totalorder %s1085_s20, %s1085_s20 }
   0x8   :  { %p1092_p3 = por %p1091_p2, %p1090_p1 }
   0xa   :  { %p1093_p4 = pnand %p1092_p3, %p1086_p0 }
   0xc   :  { %1096 = shalt.err (!%p1093_p4)
}
   0xd   :  { %s1164_s21 = smov 64   ;;  %s1165_s22 = smov 4  }
   0xe   :  { %36 = dma.hbm_to_vmem [thread:$0]  %s1314_s1, 2048, %s31_s19, [#allocation6], %s1164_s21, %s1164_s21, %s1165_s22  }
   0xf   :  { %s1166_s25 = smov [#allocation2]  }
  0x10   :  { %s18_s26 = sshll.u32 %s1166_s25, 4  ;;  %s19_s26 = int_to_ptr.vmem [resolvable:$true] %s18_s26 }
  0x11   :  { %s1105_s27 = scalar_lea.vmem %s19_s26, 6400  ;;  %s1109_s28 = scalar_lea.vmem %s19_s26, 8192 }
  0x12   :  { %p1106_p5 = scmp.ne.s32.totalorder %s19_s26, %s1105_s27  ;;  %p1110_p6 = scmp.lt.s32.totalorder %s19_s26, %s19_s26 }
  0x13   :  { %p1111_p7 = scmp.lt.s32.totalorder %s1109_s28, %s1105_s27 }
  0x15   :  { %p1112_p8 = por %p1111_p7, %p1110_p6 }
  0x17   :  { %p1113_p9 = pnand %p1112_p8, %p1106_p5 }
  0x19   :  { %1116 = shalt.err (!%p1113_p9)
}
  0x1a   :  { %s1167_s29 = smov 256   ;;  %s1168_s30 = smov 16  }
  0x1b   :  { %24 = dma.hbm_to_vmem [thread:$0]  %s1313_s0, 6400, %s19_s26, [#allocation3], %s1167_s29, %s1167_s29, %s1168_s30  }
  0x1c   :  { %s1169_s8 = smov [#allocation7]  }
  0x1d   :  { %s44_s9 = sshll.u32 %s1169_s8, 4  ;;  %s45_s9 = int_to_ptr.vmem [resolvable:$true] %s44_s9 }
  0x1e   :  { %s1125_s1 = scalar_lea.vmem %s45_s9, 1024  ;;  %p1130_p11 = scmp.lt.s32.totalorder %s45_s9, %s45_s9 }
  0x1f   :  { %p1126_p10 = scmp.ne.s32.totalorder %s45_s9, %s1125_s1  ;;  %p1131_p12 = scmp.lt.s32.totalorder %s1125_s1, %s1125_s1 }
  0x21   :  { %p1132_p13 = por %p1131_p12, %p1130_p11 }
  0x23   :  { %p1133_p0 = pnand %p1132_p13, %p1126_p10 }
  0x25   :  { %1136 = shalt.err (!%p1133_p0)
}
  0x26   :  { %50 = dma.hbm_to_vmem [thread:$0]  %s1316_s3, 1024, %s45_s9, [#allocation6], %s1164_s21, %s1164_s21, %s1165_s22  }
  0x27   :  { %1157 = dma.done.wait [#allocation3], 8192  }
  0x28   :  { %1158 = vsyncadd [#allocation3], 4294959104 }
  0x29   :  { %1159 = dma.done.wait [#allocation6], 3072  }
  0x2a   :  { %1160 = vsyncadd [#allocation6], 4294964224  ;;  %v1053_v0 = vld [vmem:[#allocation5 + $0x78] sm:$0xff]   ;;  %v1055_v2 = vld [vmem:[#allocation5 + $0x70] sm:$0xff]  }
  0x2b   :  { %v1054_v1 = vld [vmem:[#allocation5 + $0x38] sm:$0xff]   ;;  %843 = vmatprep.subr.bf16.mxu0 %v1053_v0  ;;  %1027 = vmatprep.subr.bf16.mxu1 %v1053_v0  ;;  %v1056_v3 = vld [vmem:[#allocation5 + $0x30] sm:$0xff]   ;;  %v1057_v4 = vld [vmem:[#allocation5 + $0x68] sm:$0xff]  }
  0x2c   :  { %844 = vmatpush3.bf16.msra.mxu0 %v1054_v1  ;;  %1035 = vmatpush3.bf16.msra.mxu1 %v1054_v1  ;;  %v1058_v5 = vld [vmem:[#allocation5 + $0x28] sm:$0xff]   ;;  %v1059_v6 = vld [vmem:[#allocation5 + $0x60] sm:$0xff]   ;;  %v1061_v8 = vld [vmem:[#allocation5 + $0x58] sm:$0xff]  }
  0x2d   :  { %845 = vmatprep.subr.bf16.mxu0 %v1055_v2  ;;  %1028 = vmatprep.subr.bf16.mxu1 %v1055_v2  ;;  %v1060_v7 = vld [vmem:[#allocation5 + $0x20] sm:$0xff]   ;;  %v1062_v9 = vld [vmem:[#allocation5 + $0x18] sm:$0xff]   ;;  %v1063_v10 = vld [vmem:[#allocation5 + $0x50] sm:$0xff]  }
  0x2e   :  { %v64_v11 = vld [vmem:[#allocation2 + $0x8] sm:$0xff]  ;;  %v66_v12 = vld [vmem:[#allocation2 + $0x18] sm:$0xff]  ;;  %v1064_v14 = vld [vmem:[#allocation5 + $0x10] sm:$0xff]  }
  0x2f   :  { %v128_v13 = vpack.c.bf16 %v66_v12, %v64_v11  ;;  %v1065_v15 = vld [vmem:[#allocation5 + $0x48] sm:$0xff]   ;;  %v1067_v17 = vld [vmem:[#allocation5 + $0x40] sm:$0xff]   ;;  %v65_v20 = vld [vmem:[#allocation2 + $0x10] sm:$0xff] }
  0x30   :  { %846 = vmatpush3.bf16.msra.mxu0 %v1056_v3  ;;  %1036 = vmatpush3.bf16.msra.mxu1 %v1056_v3  ;;  %v1066_v16 = vld [vmem:[#allocation5 + $0x8] sm:$0xff]   ;;  %v1068_v18 = vld [vmem:[#allocation5] sm:$0xff]   ;;  %v70_v22 = vld [vmem:[#allocation2 + $0x38] sm:$0xff] }
  0x31   :  { %847 = vmatprep.subr.bf16.mxu0 %v1057_v4  ;;  %1029 = vmatprep.subr.bf16.mxu1 %v1057_v4  ;;  %v63_v19 = vld [vmem:[#allocation2] sm:$0xff]  ;;  %v68_v21 = vld [vmem:[#allocation2 + $0x28] sm:$0xff]  ;;  %v114_v24 = vld [vmem:[#allocation2 + $0x198] sm:$0xff] }
  0x32   :  { %326 = vmatprep.mubr.bf16.mxu0 %v128_v13  ;;  %v112_v23 = vld [vmem:[#allocation2 + $0x188] sm:$0xff]  ;;  %v127_v25 = vpack.c.bf16 %v65_v20, %v63_v19  ;;  %v111_v27 = vld [vmem:[#allocation2 + $0x180] sm:$0xff]  ;;  %v113_v28 = vld [vmem:[#allocation2 + $0x190] sm:$0xff]  ;;  %v130_v29 = vpack.c.bf16 %v70_v22, %v68_v21 }
  0x33   :  { %v152_v26 = vpack.c.bf16 %v114_v24, %v112_v23  ;;  %v151_v30 = vpack.c.bf16 %v113_v28, %v111_v27  ;;  %v116_v31 = vld [vmem:[#allocation2 + $0x1a8] sm:$0xff]  ;;  %v118_v32 = vld [vmem:[#allocation2 + $0x1b8] sm:$0xff]  ;;  %v67_v34 = vld [vmem:[#allocation2 + $0x20] sm:$0xff] }
  0x34   :  { %848 = vmatpush3.bf16.msra.mxu0 %v1058_v5  ;;  %1037 = vmatpush3.bf16.msra.mxu1 %v1058_v5  ;;  %v154_v33 = vpack.c.bf16 %v118_v32, %v116_v31  ;;  %v69_v35 = vld [vmem:[#allocation2 + $0x30] sm:$0xff]  ;;  %v72_v36 = vld [vmem:[#allocation2 + $0x48] sm:$0xff]  ;;  %v74_v37 = vld [vmem:[#allocation2 + $0x58] sm:$0xff] }
  0x35   :  { %849 = vmatprep.subr.bf16.mxu0 %v1059_v6  ;;  %1030 = vmatprep.subr.bf16.mxu1 %v1059_v6  ;;  %v115_v38 = vld [vmem:[#allocation2 + $0x1a0] sm:$0xff]  ;;  %v117_v39 = vld [vmem:[#allocation2 + $0x1b0] sm:$0xff]  ;;  %v120_v40 = vld [vmem:[#allocation2 + $0x1c8] sm:$0xff]  ;;  %v129_v42 = vpack.c.bf16 %v69_v35, %v67_v34  ;;  %v132_v44 = vpack.c.bf16 %v74_v37, %v72_v36 }
  0x36   :  { %422 = vmatprep.mubr.bf16.mxu1 %v152_v26  ;;  %v122_v41 = vld [vmem:[#allocation2 + $0x1d8] sm:$0xff]  ;;  %v153_v45 = vpack.c.bf16 %v117_v39, %v115_v38  ;;  %v1070_v46 = vld [vmem:[#allocation7 + $0x30] sm:$0xff]   ;;  %v1071_v48 = vld [vmem:[#allocation7 + $0x28] sm:$0xff]  }
  0x37   :  { %v1069_v43 = vld [vmem:[#allocation7 + $0x38] sm:$0xff]   ;;  %v156_v47 = vpack.c.bf16 %v122_v41, %v120_v40  ;;  %v71_v49 = vld [vmem:[#allocation2 + $0x40] sm:$0xff]  ;;  %v73_v50 = vld [vmem:[#allocation2 + $0x50] sm:$0xff] }
  0x38   :  { %850 = vmatpush3.bf16.msra.mxu0 %v1060_v7  ;;  %1038 = vmatpush3.bf16.msra.mxu1 %v1060_v7  ;;  %v76_v51 = vld [vmem:[#allocation2 + $0x68] sm:$0xff]  ;;  %v78_v52 = vld [vmem:[#allocation2 + $0x78] sm:$0xff]  ;;  %v119_v53 = vld [vmem:[#allocation2 + $0x1c0] sm:$0xff]  ;;  %v131_v57 = vpack.c.bf16 %v73_v50, %v71_v49 }
  0x39   :  { %851 = vmatprep.subr.bf16.mxu0 %v1061_v8  ;;  %1031 = vmatprep.subr.bf16.mxu1 %v1061_v8  ;;  %v121_v54 = vld [vmem:[#allocation2 + $0x1d0] sm:$0xff]  ;;  %v124_v55 = vld [vmem:[#allocation2 + $0x1e8] sm:$0xff]  ;;  %v126_v56 = vld [vmem:[#allocation2 + $0x1f8] sm:$0xff]  ;;  %v134_v58 = vpack.c.bf16 %v78_v52, %v76_v51 }
  0x3a   :  { %v155_v59 = vpack.c.bf16 %v121_v54, %v119_v53  ;;  %v158_v60 = vpack.c.bf16 %v126_v56, %v124_v55  ;;  %v75_v61 = vld [vmem:[#allocation2 + $0x60] sm:$0xff]  ;;  %v77_v62 = vld [vmem:[#allocation2 + $0x70] sm:$0xff]  ;;  %v80_v63 = vld [vmem:[#allocation2 + $0x88] sm:$0xff] }
  0x3b   :  { %v82_v0 = vld [vmem:[#allocation2 + $0x98] sm:$0xff]  ;;  %v123_v1 = vld [vmem:[#allocation2 + $0x1e0] sm:$0xff]  ;;  %v125_v2 = vld [vmem:[#allocation2 + $0x1f0] sm:$0xff]  ;;  %v133_v3 = vpack.c.bf16 %v77_v62, %v75_v61 }
  0x3c   :  { %852 = vmatpush3.bf16.msra.mxu0 %v1062_v9  ;;  %1039 = vmatpush3.bf16.msra.mxu1 %v1062_v9  ;;  %v136_v4 = vpack.c.bf16 %v82_v0, %v80_v63  ;;  %v157_v5 = vpack.c.bf16 %v125_v2, %v123_v1  ;;  %v79_v6 = vld [vmem:[#allocation2 + $0x80] sm:$0xff]  ;;  %v81_v7 = vld [vmem:[#allocation2 + $0x90] sm:$0xff]  ;;  %v84_v8 = vld [vmem:[#allocation2 + $0xa8] sm:$0xff] }
  0x3d   :  { %853 = vmatprep.subr.bf16.mxu0 %v1063_v10  ;;  %1032 = vmatprep.subr.bf16.mxu1 %v1063_v10  ;;  %v86_v9 = vld [vmem:[#allocation2 + $0xb8] sm:$0xff]  ;;  %v135_v10 = vpack.c.bf16 %v81_v7, %v79_v6  ;;  %v83_v12 = vld [vmem:[#allocation2 + $0xa0] sm:$0xff]  ;;  %v85_v13 = vld [vmem:[#allocation2 + $0xb0] sm:$0xff] }
  0x3e   :  { %v138_v11 = vpack.c.bf16 %v86_v9, %v84_v8  ;;  %v89_v19 = vld [vmem:[#allocation2 + $0xd0] sm:$0xff]  ;;  %v92_v20 = vld [vmem:[#allocation2 + $0xe8] sm:$0xff]  ;;  %v94_v21 = vld [vmem:[#allocation2 + $0xf8] sm:$0xff] }
  0x3f   :  { %v142_v23 = vpack.c.bf16 %v94_v21, %v92_v20  ;;  %v91_v24 = vld [vmem:[#allocation2 + $0xe0] sm:$0xff]  ;;  %v96_v26 = vld [vmem:[#allocation2 + $0x108] sm:$0xff]  ;;  %v98_v27 = vld [vmem:[#allocation2 + $0x118] sm:$0xff] }
  0x40   :  { %854 = vmatpush3.bf16.msra.mxu0 %v1064_v14  ;;  %1040 = vmatpush3.bf16.msra.mxu1 %v1064_v14  ;;  %v88_v14 = vld [vmem:[#allocation2 + $0xc8] sm:$0xff]  ;;  %v97_v31 = vld [vmem:[#allocation2 + $0x110] sm:$0xff]  ;;  %v99_v36 = vld [vmem:[#allocation2 + $0x120] sm:$0xff] }
  0x41   :  { %855 = vmatprep.subr.bf16.mxu0 %v1065_v15  ;;  %1033 = vmatprep.subr.bf16.mxu1 %v1065_v15  ;;  %v90_v15 = vld [vmem:[#allocation2 + $0xd8] sm:$0xff]  ;;  %v100_v32 = vld [vmem:[#allocation2 + $0x128] sm:$0xff]  ;;  %v101_v37 = vld [vmem:[#allocation2 + $0x130] sm:$0xff] }
  0x42   :  { %v1072_v38 = vld [vmem:[#allocation7 + $0x20] sm:$0xff]   ;;  %v104_v39 = vld [vmem:[#allocation2 + $0x148] sm:$0xff]  ;;  %v106_v40 = vld [vmem:[#allocation2 + $0x158] sm:$0xff]  ;;  %v145_v41 = vpack.c.bf16 %v101_v37, %v99_v36 }
  0x43   :  { %v1075_v51 = vld [vmem:[#allocation7 + $0x8] sm:$0xff]   ;;  %v107_v52 = vld [vmem:[#allocation2 + $0x160] sm:$0xff]  ;;  %v109_v53 = vld [vmem:[#allocation2 + $0x170] sm:$0xff] }
  0x44   :  { %856 = vmatpush3.bf16.msra.mxu0 %v1066_v16  ;;  %1041 = vmatpush3.bf16.msra.mxu1 %v1066_v16  ;;  %v137_v16 = vpack.c.bf16 %v85_v13, %v83_v12  ;;  %v1076_v54 = vld [vmem:[#allocation7] sm:$0xff]   ;;  %v149_v55 = vpack.c.bf16 %v109_v53, %v107_v52 }
  0x45   :  { %857 = vmatprep.subr.bf16.mxu0 %v1067_v17  ;;  %1034 = vmatprep.subr.bf16.mxu1 %v1067_v17  ;;  %v140_v17 = vpack.c.bf16 %v90_v15, %v88_v14 }
  0x48   :  { %858 = vmatpush3.bf16.msra.mxu0 %v1068_v18  ;;  %1042 = vmatpush3.bf16.msra.mxu1 %v1068_v18  ;;  %v87_v18 = vld [vmem:[#allocation2 + $0xc0] sm:$0xff] }
  0x49   :  { %979 = vmatprep.subr.bf16.mxu1 %v1069_v43  ;;  %v139_v22 = vpack.c.bf16 %v89_v19, %v87_v18 }
  0x4b   :  { %327 = vmatmul.mubr.bf16.vlgmr.msra.gmra.mxu0 %v127_v25  ;;  %423 = vmatmul.mubr.bf16.vlgmr.msra.gmra.mxu1 %v151_v30  ;;  %v93_v25 = vld [vmem:[#allocation2 + $0xf0] sm:$0xff]  ;;  %v95_v30 = vld [vmem:[#allocation2 + $0x100] sm:$0xff] }
  0x4c   :  { %334 = vmatprep.mubr.bf16.mxu0 %v130_v29  ;;  %430 = vmatprep.mubr.bf16.mxu1 %v154_v33  ;;  %v141_v28 = vpack.c.bf16 %v93_v25, %v91_v24  ;;  %v144_v29 = vpack.c.bf16 %v98_v27, %v96_v26  ;;  %v102_v33 = vld [vmem:[#allocation2 + $0x138] sm:$0xff]  ;;  %v143_v34 = vpack.c.bf16 %v97_v31, %v95_v30 }
  0x4d   :  { %980 = vmatpush3.bf16.msra.mxu1 %v1069_v43  ;;  %v146_v35 = vpack.c.bf16 %v102_v33, %v100_v32  ;;  %v1073_v43 = vld [vmem:[#allocation7 + $0x18] sm:$0xff]  }
  0x4e   :  { %981 = vmatprep.subr.bf16.mxu1 %v1070_v46 }
  0x51   :  { %982 = vmatpush3.bf16.msra.mxu1 %v1070_v46  ;;  %v1074_v46 = vld [vmem:[#allocation7 + $0x10] sm:$0xff]  }
  0x52   :  { %983 = vmatprep.subr.bf16.mxu1 %v1071_v48 }
  0x53   :  { %335 = vmatmul.mubr.bf16.gmra.mxu0 %v129_v42  ;;  %431 = vmatmul.mubr.bf16.gmra.mxu1 %v153_v45  ;;  %v148_v42 = vpack.c.bf16 %v106_v40, %v104_v39  ;;  %v105_v45 = vld [vmem:[#allocation2 + $0x150] sm:$0xff] }
  0x54   :  { %342 = vmatprep.mubr.bf16.mxu0 %v132_v44  ;;  %438 = vmatprep.mubr.bf16.mxu1 %v156_v47  ;;  %v103_v44 = vld [vmem:[#allocation2 + $0x140] sm:$0xff]  ;;  %v108_v47 = vld [vmem:[#allocation2 + $0x168] sm:$0xff] }
  0x55   :  { %984 = vmatpush3.bf16.msra.mxu1 %v1071_v48  ;;  %v110_v48 = vld [vmem:[#allocation2 + $0x178] sm:$0xff]  ;;  %v147_v49 = vpack.c.bf16 %v105_v45, %v103_v44 }
  0x56   :  { %985 = vmatprep.subr.bf16.mxu1 %v1072_v38  ;;  %v150_v50 = vpack.c.bf16 %v110_v48, %v108_v47 }
  0x59   :  { %986 = vmatpush3.bf16.msra.mxu1 %v1072_v38 }
  0x5a   :  { %987 = vmatprep.subr.bf16.mxu1 %v1073_v43 }
  0x5b   :  { %343 = vmatmul.mubr.bf16.gmra.mxu0 %v131_v57  ;;  %439 = vmatmul.mubr.bf16.gmra.mxu1 %v155_v59  ;;  %v1221_v59 = vld [vmem:[%s1315_s2] ss:$0 sm:$0xff] }
  0x5c   :  { %350 = vmatprep.mubr.bf16.mxu0 %v134_v58  ;;  %446 = vmatprep.mubr.bf16.mxu1 %v158_v60 }
  0x5d   :  { %988 = vmatpush3.bf16.msra.mxu1 %v1073_v43 }
  0x5e   :  { %989 = vmatprep.subr.bf16.mxu1 %v1074_v46 }
  0x61   :  { %990 = vmatpush3.bf16.msra.mxu1 %v1074_v46 }
  0x62   :  { %991 = vmatprep.subr.bf16.mxu1 %v1075_v51 }
  0x63   :  { %351 = vmatmul.mubr.bf16.gmra.mxu0 %v133_v3  ;;  %447 = vmatmul.mubr.bf16.gmra.mxu1 %v157_v5 }
  0x64   :  { %358 = vmatprep.mubr.bf16.mxu0 %v136_v4 }
  0x65   :  { %992 = vmatpush3.bf16.msra.mxu1 %v1075_v51 }
  0x66   :  { %993 = vmatprep.subr.bf16.mxu1 %v1076_v54 }
  0x69   :  { %994 = vmatpush3.bf16.msra.mxu1 %v1076_v54 }
  0x6b   :  { %359 = vmatmul.mubr.bf16.gmra.mxu0 %v135_v10 }
  0x6c   :  { %366 = vmatprep.mubr.bf16.mxu0 %v138_v11 }
  0x73   :  { %367 = vmatmul.mubr.bf16.gmra.mxu0 %v137_v16 }
  0x74   :  { %374 = vmatprep.mubr.bf16.mxu0 %v140_v17 }
  0x7b   :  { %375 = vmatmul.mubr.bf16.gmra.mxu0 %v139_v22 }
  0x7c   :  { %382 = vmatprep.mubr.bf16.mxu0 %v142_v23 }
  0x83   :  { %383 = vmatmul.mubr.bf16.gmra.mxu0 %v141_v28 }
  0x84   :  { %390 = vmatprep.mubr.bf16.mxu0 %v144_v29 }
  0x8b   :  { %391 = vmatmul.mubr.bf16.gmra.mxu0 %v143_v34 }
  0x8c   :  { %398 = vmatprep.mubr.bf16.mxu0 %v146_v35 }
  0x93   :  { %399 = vmatmul.mubr.bf16.gmra.mxu0 %v145_v41 }
  0x94   :  { %406 = vmatprep.mubr.bf16.mxu0 %v148_v42 }
  0x9b   :  { %407 = vmatmul.mubr.bf16.gmra.mxu0 %v147_v49 }
  0x9c   :  { %414 = vmatprep.mubr.bf16.mxu0 %v150_v50 }
  0xa3   :  { %415 = vmatmul.mubr.bf16.gmra.mxu0 %v149_v55 }
 0x10b   :  { %v859_v56 = vpop.f32.mrf.mxu0  ;;  %v1233_v47 = vpop.f32.mrf.mxu1 }
 0x10d   :  { %v860_v57 = vpop.f32.mrf.mxu0  ;;  %v1235_v54 = vpop.f32.mrf.mxu1 }
 0x10e   :  { %v861_v58 = vadd.f32 %v860_v57, %v859_v56 }
 0x10f   :  { %v862_v60 = vpop.f32.mrf.mxu0 }
 0x110   :  { %v329_v62 = vadd.f32 %v861_v58, %v1221_v59 }
 0x111   :  { %v863_v61 = vpop.f32.mrf.mxu0 }
 0x112   :  { %v864_v63 = vadd.f32 %v863_v61, %v862_v60  ;;  %v455_v3 = vmax.f32 %v329_v62, 0.0  ;;  %v1239_v61 = vpop.f32.mrf.mxu1 }
 0x113   :  { %v865_v0 = vpop.f32.mrf.mxu0 }
 0x114   :  { %v332_v1 = vadd.f32 %v864_v63, %v1221_v59 }
 0x115   :  { %v866_v2 = vpop.f32.mrf.mxu0 }
 0x116   :  { %v456_v4 = vmax.f32 %v332_v1, 0.0  ;;  %v867_v5 = vadd.f32 %v866_v2, %v865_v0 }
 0x117   :  { %v868_v6 = vpop.f32.mrf.mxu0 }
 0x118   :  { %v487_v7 = vpack.c.bf16 %v456_v4, %v455_v3  ;;  %v337_v9 = vadd.f32 %v867_v5, %v1221_v59  ;;  %v1241_v4 = vpop.f32.mrf.mxu1 }
 0x119   :  { %v869_v8 = vpop.f32.mrf.mxu0 }
 0x11a   :  { %v870_v10 = vadd.f32 %v869_v8, %v868_v6  ;;  %995 = vmatprep.mubr.bf16.mxu1 %v487_v7  ;;  %v457_v14 = vmax.f32 %v337_v9, 0.0 }
 0x11b   :  { %v871_v11 = vpop.f32.mrf.mxu0 }
 0x11c   :  { %v340_v12 = vadd.f32 %v870_v10, %v1221_v59  ;;  %v1245_v10 = vpop.f32.mrf.mxu1 }
 0x11d   :  { %v872_v13 = vpop.f32.mrf.mxu0 }
 0x11e   :  { %v458_v15 = vmax.f32 %v340_v12, 0.0  ;;  %v873_v16 = vadd.f32 %v872_v13, %v871_v11 }
 0x11f   :  { %v874_v17 = vpop.f32.mrf.mxu0 }
 0x120   :  { %v488_v18 = vpack.c.bf16 %v458_v15, %v457_v14  ;;  %v345_v20 = vadd.f32 %v873_v16, %v1221_v59 }
 0x121   :  { %v875_v19 = vpop.f32.mrf.mxu0 }
 0x122   :  { %v876_v21 = vadd.f32 %v875_v19, %v874_v17  ;;  %996 = vmatmul.mubr.bf16.vlgmr.msra.gmra.mxu1 %v488_v18  ;;  %v459_v25 = vmax.f32 %v345_v20, 0.0  ;;  %v1247_v17 = vpop.f32.mrf.mxu1 }
 0x123   :  { %v877_v22 = vpop.f32.mrf.mxu0 }
 0x124   :  { %v348_v23 = vadd.f32 %v876_v21, %v1221_v59 }
 0x125   :  { %v878_v24 = vpop.f32.mrf.mxu0 }
 0x126   :  { %v460_v26 = vmax.f32 %v348_v23, 0.0  ;;  %v879_v27 = vadd.f32 %v878_v24, %v877_v22  ;;  %v940_v23 = vpop.f32.mrf.mxu1 }
 0x127   :  { %v880_v28 = vpop.f32.mrf.mxu0 }
 0x128   :  { %v489_v29 = vpack.c.bf16 %v460_v26, %v459_v25  ;;  %v353_v31 = vadd.f32 %v879_v27, %v1221_v59 }
 0x129   :  { %v881_v30 = vpop.f32.mrf.mxu0 }
 0x12a   :  { %v882_v32 = vadd.f32 %v881_v30, %v880_v28  ;;  %999 = vmatprep.mubr.bf16.mxu1 %v489_v29  ;;  %v461_v36 = vmax.f32 %v353_v31, 0.0  ;;  %v941_v30 = vpop.f32.mrf.mxu1 }
 0x12b   :  { %v883_v33 = vpop.f32.mrf.mxu0 }
 0x12c   :  { %v356_v34 = vadd.f32 %v882_v32, %v1221_v59 }
 0x12d   :  { %v884_v35 = vpop.f32.mrf.mxu0 }
 0x12e   :  { %v462_v37 = vmax.f32 %v356_v34, 0.0  ;;  %v885_v38 = vadd.f32 %v884_v35, %v883_v33 }
 0x12f   :  { %v886_v39 = vpop.f32.mrf.mxu0 }
 0x130   :  { %v490_v40 = vpack.c.bf16 %v462_v37, %v461_v36  ;;  %v361_v42 = vadd.f32 %v885_v38, %v1221_v59  ;;  %v943_v36 = vpop.f32.mrf.mxu1 }
 0x131   :  { %v887_v41 = vpop.f32.mrf.mxu0 }
 0x132   :  { %v888_v43 = vadd.f32 %v887_v41, %v886_v39  ;;  %1000 = vmatmul.mubr.bf16.gmra.mxu1 %v490_v40  ;;  %v463_v48 = vmax.f32 %v361_v42, 0.0 }
 0x133   :  { %v889_v44 = vpop.f32.mrf.mxu0 }
 0x134   :  { %v364_v45 = vadd.f32 %v888_v43, %v1221_v59  ;;  %v944_v43 = vpop.f32.mrf.mxu1 }
 0x135   :  { %v890_v46 = vpop.f32.mrf.mxu0 }
 0x136   :  { %v464_v49 = vmax.f32 %v364_v45, 0.0  ;;  %v891_v50 = vadd.f32 %v890_v46, %v889_v44 }
 0x137   :  { %v892_v51 = vpop.f32.mrf.mxu0 }
 0x138   :  { %v491_v52 = vpack.c.bf16 %v464_v49, %v463_v48  ;;  %v369_v55 = vadd.f32 %v891_v50, %v1221_v59  ;;  %v946_v50 = vpop.f32.mrf.mxu1 }
 0x139   :  { %v893_v53 = vpop.f32.mrf.mxu0 }
 0x13a   :  { %v894_v56 = vadd.f32 %v893_v53, %v892_v51  ;;  %1003 = vmatprep.mubr.bf16.mxu1 %v491_v52  ;;  %v465_v62 = vmax.f32 %v369_v55, 0.0 }
 0x13b   :  { %v895_v57 = vpop.f32.mrf.mxu0 }
 0x13c   :  { %v372_v58 = vadd.f32 %v894_v56, %v1221_v59 }
 0x13d   :  { %v896_v60 = vpop.f32.mrf.mxu0 }
 0x13e   :  { %v466_v63 = vmax.f32 %v372_v58, 0.0  ;;  %v897_v0 = vadd.f32 %v896_v60, %v895_v57  ;;  %v947_v58 = vpop.f32.mrf.mxu1 }
 0x13f   :  { %v898_v1 = vpop.f32.mrf.mxu0 }
 0x140   :  { %v492_v2 = vpack.c.bf16 %v466_v63, %v465_v62  ;;  %v377_v5 = vadd.f32 %v897_v0, %v1221_v59 }
 0x141   :  { %v899_v3 = vpop.f32.mrf.mxu0 }
 0x142   :  { %v900_v6 = vadd.f32 %v899_v3, %v898_v1  ;;  %1004 = vmatmul.mubr.bf16.gmra.mxu1 %v492_v2  ;;  %v467_v11 = vmax.f32 %v377_v5, 0.0  ;;  %v933_v1 = vadd.f32 %v1235_v54, %v1233_v47  ;;  %v936_v2 = vadd.f32 %v1241_v4, %v1239_v61  ;;  %v949_v5 = vpop.f32.mrf.mxu1 }
 0x143   :  { %v901_v7 = vpop.f32.mrf.mxu0  ;;  %v939_v47 = vadd.f32 %v1247_v17, %v1245_v10  ;;  %v942_v54 = vadd.f32 %v941_v30, %v940_v23 }
 0x144   :  { %v380_v8 = vadd.f32 %v900_v6, %v1221_v59 }
 0x145   :  { %v902_v9 = vpop.f32.mrf.mxu0 }
 0x146   :  { %v468_v12 = vmax.f32 %v380_v8, 0.0  ;;  %v903_v13 = vadd.f32 %v902_v9, %v901_v7 }
 0x147   :  { %v904_v14 = vpop.f32.mrf.mxu0 }
 0x148   :  { %v493_v15 = vpack.c.bf16 %v468_v12, %v467_v11  ;;  %v385_v18 = vadd.f32 %v903_v13, %v1221_v59  ;;  %v425_v12 = vadd.f32 %v933_v1, %v1221_v59  ;;  %v428_v13 = vadd.f32 %v936_v2, %v1221_v59 }
 0x149   :  { %v905_v16 = vpop.f32.mrf.mxu0 }
 0x14a   :  { %v906_v19 = vadd.f32 %v905_v16, %v904_v14  ;;  %1007 = vmatprep.mubr.bf16.mxu1 %v493_v15  ;;  %v469_v24 = vmax.f32 %v385_v18, 0.0  ;;  %v950_v15 = vpop.f32.mrf.mxu1  ;;  %v479_v4 = vmax.f32 %v425_v12, 0.0 }
 0x14b   :  { %v907_v20 = vpop.f32.mrf.mxu0 }
 0x14c   :  { %v388_v21 = vadd.f32 %v906_v19, %v1221_v59  ;;  %v480_v19 = vmax.f32 %v428_v13, 0.0 }
 0x14d   :  { %v908_v22 = vpop.f32.mrf.mxu0 }
 0x14e   :  { %v470_v25 = vmax.f32 %v388_v21, 0.0  ;;  %v909_v26 = vadd.f32 %v908_v22, %v907_v20  ;;  %v945_v20 = vadd.f32 %v944_v43, %v943_v36  ;;  %v948_v21 = vadd.f32 %v947_v58, %v946_v50  ;;  %v952_v22 = vpop.f32.mrf.mxu1  ;;  %v1276_v43 = vld [vmem:[%s1317_s4] ss:$0 sm:$0xff] }
 0x14f   :  { %v910_v27 = vpop.f32.mrf.mxu0  ;;  %v499_v17 = vpack.c.bf16 %v480_v19, %v479_v4 }
 0x150   :  { %v494_v28 = vpack.c.bf16 %v470_v25, %v469_v24  ;;  %v393_v31 = vadd.f32 %v909_v26, %v1221_v59  ;;  %v433_v26 = vadd.f32 %v939_v47, %v1221_v59  ;;  %v953_v10 = vpop.f32.mrf.mxu1 }
 0x151   :  { %v911_v29 = vpop.f32.mrf.mxu0 }
 0x152   :  { %v912_v32 = vadd.f32 %v911_v29, %v910_v27  ;;  %1008 = vmatmul.mubr.bf16.gmra.mxu1 %v494_v28  ;;  %v471_v37 = vmax.f32 %v393_v31, 0.0  ;;  %v436_v27 = vadd.f32 %v942_v54, %v1221_v59  ;;  %v441_v29 = vadd.f32 %v945_v20, %v1221_v59 }
 0x153   :  { %v913_v33 = vpop.f32.mrf.mxu0  ;;  %v444_v31 = vadd.f32 %v948_v21, %v1221_v59  ;;  %v481_v23 = vmax.f32 %v433_v26, 0.0 }
 0x154   :  { %v396_v34 = vadd.f32 %v912_v32, %v1221_v59  ;;  %v482_v30 = vmax.f32 %v436_v27, 0.0  ;;  %v951_v32 = vadd.f32 %v950_v15, %v949_v5 }
 0x155   :  { %v914_v35 = vpop.f32.mrf.mxu0 }
 0x156   :  { %v472_v38 = vmax.f32 %v396_v34, 0.0  ;;  %v915_v39 = vadd.f32 %v914_v35, %v913_v33  ;;  %v954_v33 = vadd.f32 %v953_v10, %v952_v22  ;;  %v483_v34 = vmax.f32 %v441_v29, 0.0 }
 0x157   :  { %v916_v40 = vpop.f32.mrf.mxu0  ;;  %v484_v35 = vmax.f32 %v444_v31, 0.0  ;;  %v449_v36 = vadd.f32 %v951_v32, %v1221_v59 }
 0x158   :  { %v495_v41 = vpack.c.bf16 %v472_v38, %v471_v37  ;;  %v401_v44 = vadd.f32 %v915_v39, %v1221_v59  ;;  %v452_v37 = vadd.f32 %v954_v33, %v1221_v59  ;;  %v500_v38 = vpack.c.bf16 %v482_v30, %v481_v23 }
 0x159   :  { %v917_v42 = vpop.f32.mrf.mxu0  ;;  %v501_v39 = vpack.c.bf16 %v484_v35, %v483_v34 }
 0x15a   :  { %v918_v45 = vadd.f32 %v917_v42, %v916_v40  ;;  %1011 = vmatprep.mubr.bf16.mxu1 %v495_v41  ;;  %v473_v51 = vmax.f32 %v401_v44, 0.0  ;;  %v485_v40 = vmax.f32 %v449_v36, 0.0  ;;  %v486_v41 = vmax.f32 %v452_v37, 0.0 }
 0x15b   :  { %v919_v46 = vpop.f32.mrf.mxu0 }
 0x15c   :  { %v404_v48 = vadd.f32 %v918_v45, %v1221_v59  ;;  %v502_v42 = vpack.c.bf16 %v486_v41, %v485_v40 }
 0x15d   :  { %v920_v49 = vpop.f32.mrf.mxu0 }
 0x15e   :  { %v474_v52 = vmax.f32 %v404_v48, 0.0  ;;  %v921_v53 = vadd.f32 %v920_v49, %v919_v46 }
 0x15f   :  { %v922_v55 = vpop.f32.mrf.mxu0 }
 0x160   :  { %v496_v56 = vpack.c.bf16 %v474_v52, %v473_v51  ;;  %v409_v60 = vadd.f32 %v921_v53, %v1221_v59 }
 0x161   :  { %v923_v57 = vpop.f32.mrf.mxu0 }
 0x162   :  { %v924_v62 = vadd.f32 %v923_v57, %v922_v55  ;;  %1012 = vmatmul.mubr.bf16.gmra.mxu1 %v496_v56  ;;  %v475_v6 = vmax.f32 %v409_v60, 0.0 }
 0x163   :  { %v925_v63 = vpop.f32.mrf.mxu0 }
 0x164   :  { %v412_v0 = vadd.f32 %v924_v62, %v1221_v59 }
 0x165   :  { %v926_v3 = vpop.f32.mrf.mxu0 }
 0x166   :  { %v476_v7 = vmax.f32 %v412_v0, 0.0  ;;  %v927_v8 = vadd.f32 %v926_v3, %v925_v63 }
 0x167   :  { %v928_v9 = vpop.f32.mrf.mxu0 }
 0x168   :  { %v497_v11 = vpack.c.bf16 %v476_v7, %v475_v6  ;;  %v417_v16 = vadd.f32 %v927_v8, %v1221_v59 }
 0x169   :  { %v929_v14 = vpop.f32.mrf.mxu0 }
 0x16a   :  { %v930_v18 = vadd.f32 %v929_v14, %v928_v9  ;;  %1015 = vmatprep.mubr.bf16.mxu1 %v497_v11  ;;  %v477_v24 = vmax.f32 %v417_v16, 0.0 }
 0x16c   :  { %v420_v61 = vadd.f32 %v930_v18, %v1221_v59 }
 0x16e   :  { %v478_v25 = vmax.f32 %v420_v61, 0.0 }
 0x170   :  { %v498_v28 = vpack.c.bf16 %v478_v25, %v477_v24 }
 0x172   :  { %1016 = vmatmul.mubr.bf16.gmra.mxu1 %v498_v28 }
 0x173   :  { %1019 = vmatprep.mubr.bf16.mxu1 %v499_v17 }
 0x17a   :  { %1020 = vmatmul.mubr.bf16.gmra.mxu1 %v500_v38 }
 0x17b   :  { %1023 = vmatprep.mubr.bf16.mxu1 %v501_v39 }
 0x182   :  { %1024 = vmatmul.mubr.bf16.gmra.mxu1 %v502_v42 }
 0x1e2   :  { %v997_v44 = vpop.f32.mrf.mxu1 }
 0x1e3   :  { %v617_v45 = vadd.f32 %v997_v44, %v1276_v43 }
 0x1e4   :  { %v608_v46 = vpop.f32.mrf.mxu1 }
 0x1e5   :  { %v737_v48 = vmax.f32 %v617_v45, 0.0  ;;  %v609_v59 = vadd.f32 %v1276_v43, %v608_v46 }
 0x1e6   :  { %v998_v49 = vpop.f32.mrf.mxu1 }
 0x1e7   :  { %769 = vst [vmem:[#allocation8 + $0x10] sm:$0xff] %v737_v48  ;;  %v735_v50 = vmax.f32 %v609_v59, 0.0  ;;  %v620_v51 = vadd.f32 %v998_v49, %v1276_v43 }
 0x1e8   :  { %v611_v52 = vpop.f32.mrf.mxu1 }
 0x1e9   :  { %767 = vst [vmem:[#allocation8] sm:$0xff] %v735_v50  ;;  %v738_v53 = vmax.f32 %v620_v51, 0.0  ;;  %v612_v55 = vadd.f32 %v1276_v43, %v611_v52 }
 0x1eb   :  { %770 = vst [vmem:[#allocation8 + $0x18] sm:$0xff] %v738_v53  ;;  %v736_v56 = vmax.f32 %v612_v55, 0.0 }
 0x1ed   :  { %768 = vst [vmem:[#allocation8 + $0x8] sm:$0xff] %v736_v56 }
 0x1f2   :  { %v1001_v57 = vpop.f32.mrf.mxu1 }
 0x1f3   :  { %v633_v58 = vadd.f32 %v1001_v57, %v1276_v43 }
 0x1f4   :  { %v624_v60 = vpop.f32.mrf.mxu1 }
 0x1f5   :  { %v741_v62 = vmax.f32 %v633_v58, 0.0  ;;  %v625_v63 = vadd.f32 %v1276_v43, %v624_v60 }
 0x1f6   :  { %v1002_v0 = vpop.f32.mrf.mxu1 }
 0x1f7   :  { %773 = vst [vmem:[#allocation8 + $0x30] sm:$0xff] %v741_v62  ;;  %v739_v1 = vmax.f32 %v625_v63, 0.0  ;;  %v636_v2 = vadd.f32 %v1002_v0, %v1276_v43 }
 0x1f8   :  { %v627_v3 = vpop.f32.mrf.mxu1 }
 0x1f9   :  { %771 = vst [vmem:[#allocation8 + $0x20] sm:$0xff] %v739_v1  ;;  %v742_v5 = vmax.f32 %v636_v2, 0.0  ;;  %v628_v6 = vadd.f32 %v1276_v43, %v627_v3 }
 0x1fb   :  { %774 = vst [vmem:[#allocation8 + $0x38] sm:$0xff] %v742_v5  ;;  %v740_v7 = vmax.f32 %v628_v6, 0.0 }
 0x1fd   :  { %772 = vst [vmem:[#allocation8 + $0x28] sm:$0xff] %v740_v7 }
 0x202   :  { %v1005_v8 = vpop.f32.mrf.mxu1 }
 0x203   :  { %v649_v9 = vadd.f32 %v1005_v8, %v1276_v43 }
 0x204   :  { %v640_v11 = vpop.f32.mrf.mxu1 }
 0x205   :  { %v745_v12 = vmax.f32 %v649_v9, 0.0  ;;  %v641_v13 = vadd.f32 %v1276_v43, %v640_v11 }
 0x206   :  { %v1006_v14 = vpop.f32.mrf.mxu1 }
 0x207   :  { %777 = vst [vmem:[#allocation8 + $0x50] sm:$0xff] %v745_v12  ;;  %v743_v15 = vmax.f32 %v641_v13, 0.0  ;;  %v652_v16 = vadd.f32 %v1006_v14, %v1276_v43 }
 0x208   :  { %v643_v18 = vpop.f32.mrf.mxu1 }
 0x209   :  { %775 = vst [vmem:[#allocation8 + $0x40] sm:$0xff] %v743_v15  ;;  %v746_v47 = vmax.f32 %v652_v16, 0.0  ;;  %v644_v54 = vadd.f32 %v1276_v43, %v643_v18 }
 0x20b   :  { %778 = vst [vmem:[#allocation8 + $0x58] sm:$0xff] %v746_v47  ;;  %v744_v61 = vmax.f32 %v644_v54, 0.0 }
 0x20d   :  { %776 = vst [vmem:[#allocation8 + $0x48] sm:$0xff] %v744_v61 }
 0x212   :  { %v1009_v4 = vpop.f32.mrf.mxu1 }
 0x213   :  { %v665_v19 = vadd.f32 %v1009_v4, %v1276_v43 }
 0x214   :  { %v656_v20 = vpop.f32.mrf.mxu1 }
 0x215   :  { %v749_v21 = vmax.f32 %v665_v19, 0.0  ;;  %v657_v22 = vadd.f32 %v1276_v43, %v656_v20 }
 0x216   :  { %v1010_v24 = vpop.f32.mrf.mxu1 }
 0x217   :  { %781 = vst [vmem:[#allocation8 + $0x70] sm:$0xff] %v749_v21  ;;  %v747_v25 = vmax.f32 %v657_v22, 0.0  ;;  %v668_v26 = vadd.f32 %v1010_v24, %v1276_v43 }
 0x218   :  { %v659_v27 = vpop.f32.mrf.mxu1 }
 0x219   :  { %779 = vst [vmem:[#allocation8 + $0x60] sm:$0xff] %v747_v25  ;;  %v750_v28 = vmax.f32 %v668_v26, 0.0  ;;  %v660_v29 = vadd.f32 %v1276_v43, %v659_v27 }
 0x21b   :  { %782 = vst [vmem:[#allocation8 + $0x78] sm:$0xff] %v750_v28  ;;  %v748_v31 = vmax.f32 %v660_v29, 0.0 }
 0x21d   :  { %780 = vst [vmem:[#allocation8 + $0x68] sm:$0xff] %v748_v31 }
 0x222   :  { %v1013_v10 = vpop.f32.mrf.mxu1 }
 0x223   :  { %v681_v17 = vadd.f32 %v1013_v10, %v1276_v43 }
 0x224   :  { %v672_v23 = vpop.f32.mrf.mxu1 }
 0x225   :  { %v753_v30 = vmax.f32 %v681_v17, 0.0  ;;  %v673_v32 = vadd.f32 %v1276_v43, %v672_v23 }
 0x226   :  { %v1014_v33 = vpop.f32.mrf.mxu1 }
 0x227   :  { %785 = vst [vmem:[#allocation8 + $0x90] sm:$0xff] %v753_v30  ;;  %v751_v34 = vmax.f32 %v673_v32, 0.0  ;;  %v684_v35 = vadd.f32 %v1014_v33, %v1276_v43 }
 0x228   :  { %v675_v36 = vpop.f32.mrf.mxu1 }
 0x229   :  { %783 = vst [vmem:[#allocation8 + $0x80] sm:$0xff] %v751_v34  ;;  %v754_v37 = vmax.f32 %v684_v35, 0.0  ;;  %v676_v38 = vadd.f32 %v1276_v43, %v675_v36 }
 0x22b   :  { %786 = vst [vmem:[#allocation8 + $0x98] sm:$0xff] %v754_v37  ;;  %v752_v39 = vmax.f32 %v676_v38, 0.0 }
 0x22d   :  { %784 = vst [vmem:[#allocation8 + $0x88] sm:$0xff] %v752_v39 }
 0x232   :  { %v1017_v40 = vpop.f32.mrf.mxu1 }
 0x233   :  { %v697_v41 = vadd.f32 %v1017_v40, %v1276_v43 }
 0x234   :  { %v688_v42 = vpop.f32.mrf.mxu1 }
 0x235   :  { %v757_v44 = vmax.f32 %v697_v41, 0.0  ;;  %v689_v45 = vadd.f32 %v1276_v43, %v688_v42 }
 0x236   :  { %v1018_v46 = vpop.f32.mrf.mxu1 }
 0x237   :  { %789 = vst [vmem:[#allocation8 + $0xb0] sm:$0xff] %v757_v44  ;;  %v755_v48 = vmax.f32 %v689_v45, 0.0  ;;  %v700_v59 = vadd.f32 %v1018_v46, %v1276_v43 }
 0x238   :  { %v691_v49 = vpop.f32.mrf.mxu1 }
 0x239   :  { %787 = vst [vmem:[#allocation8 + $0xa0] sm:$0xff] %v755_v48  ;;  %v758_v50 = vmax.f32 %v700_v59, 0.0  ;;  %v692_v51 = vadd.f32 %v1276_v43, %v691_v49 }
 0x23a   :  { %v1021_v52 = vpop.f32.mrf.mxu1 }
 0x23b   :  { %790 = vst [vmem:[#allocation8 + $0xb8] sm:$0xff] %v758_v50  ;;  %v756_v53 = vmax.f32 %v692_v51, 0.0  ;;  %v713_v55 = vadd.f32 %v1021_v52, %v1276_v43 }
 0x23c   :  { %v704_v56 = vpop.f32.mrf.mxu1 }
 0x23d   :  { %788 = vst [vmem:[#allocation8 + $0xa8] sm:$0xff] %v756_v53  ;;  %v761_v57 = vmax.f32 %v713_v55, 0.0  ;;  %v705_v58 = vadd.f32 %v1276_v43, %v704_v56 }
 0x23e   :  { %v1022_v60 = vpop.f32.mrf.mxu1 }
 0x23f   :  { %793 = vst [vmem:[#allocation8 + $0xd0] sm:$0xff] %v761_v57  ;;  %v759_v62 = vmax.f32 %v705_v58, 0.0  ;;  %v716_v63 = vadd.f32 %v1022_v60, %v1276_v43 }
 0x240   :  { %v707_v0 = vpop.f32.mrf.mxu1 }
 0x241   :  { %791 = vst [vmem:[#allocation8 + $0xc0] sm:$0xff] %v759_v62  ;;  %v762_v1 = vmax.f32 %v716_v63, 0.0  ;;  %v708_v2 = vadd.f32 %v1276_v43, %v707_v0 }
 0x242   :  { %v1025_v3 = vpop.f32.mrf.mxu1 }
 0x243   :  { %794 = vst [vmem:[#allocation8 + $0xd8] sm:$0xff] %v762_v1  ;;  %v760_v5 = vmax.f32 %v708_v2, 0.0  ;;  %v729_v6 = vadd.f32 %v1025_v3, %v1276_v43 }
 0x244   :  { %v720_v7 = vpop.f32.mrf.mxu1 }
 0x245   :  { %792 = vst [vmem:[#allocation8 + $0xc8] sm:$0xff] %v760_v5  ;;  %v765_v8 = vmax.f32 %v729_v6, 0.0  ;;  %v721_v9 = vadd.f32 %v1276_v43, %v720_v7 }
 0x246   :  { %v1026_v11 = vpop.f32.mrf.mxu1 }
 0x247   :  { %797 = vst [vmem:[#allocation8 + $0xf0] sm:$0xff] %v765_v8  ;;  %v763_v12 = vmax.f32 %v721_v9, 0.0  ;;  %v732_v13 = vadd.f32 %v1026_v11, %v1276_v43 }
 0x248   :  { %v723_v14 = vpop.f32.mrf.mxu1 }
 0x249   :  { %795 = vst [vmem:[#allocation8 + $0xe0] sm:$0xff] %v763_v12  ;;  %v766_v15 = vmax.f32 %v732_v13, 0.0  ;;  %v724_v16 = vadd.f32 %v1276_v43, %v723_v14 }
 0x24b   :  { %798 = vst [vmem:[#allocation8 + $0xf8] sm:$0xff] %v766_v15  ;;  %v764_v18 = vmax.f32 %v724_v16, 0.0 }
 0x24d   :  { %796 = vst [vmem:[#allocation8 + $0xe8] sm:$0xff] %v764_v18 }
 0x24e   :  { %803 = vsyncadd [#allocation4], 896  ;;  %s1170_s4 = smov [#allocation8]  }
 0x24f   :  { %s804_s13 = sshll.u32 %s1170_s4, 4  ;;  %s805_s13 = int_to_ptr.vmem [resolvable:$true] %s804_s13 }
 0x250   :  { %s1137_s14 = scalar_lea.vmem %s805_s13, 3200  ;;  %s1141_s15 = scalar_lea.vmem %s805_s13, 4096 }
 0x251   :  { %p1138_p1 = scmp.ne.s32.totalorder %s805_s13, %s1137_s14  ;;  %p1142_p2 = scmp.lt.s32.totalorder %s805_s13, %s805_s13 }
 0x252   :  { %p1143_p3 = scmp.lt.s32.totalorder %s1141_s15, %s1137_s14 }
 0x254   :  { %p1144_p4 = por %p1143_p3, %p1142_p2 }
 0x256   :  { %p1145_p5 = pnand %p1144_p4, %p1138_p1 }
 0x258   :  { %1148 = shalt.err (!%p1145_p5)
}
 0x259   :  { %s1171_s16 = smov 128   ;;  %s1172_s17 = smov 8  }
 0x25a   :  { %810 = dma.vmem_to_hbm [thread:$0]  %s805_s13, 3200, %s1318_s5, [#allocation4], %s1171_s16, %s1171_s16, %s1172_s17  }
 0x25b   :  { %1161 = dma.done.wait [#allocation4], 4096  }
 0x25c   :  { %1162 = vsyncadd [#allocation4], 4294963200 }
 0x25d   :  { %814 = vsyncpa [#allocation3], 1 }
 0x25e   :  { %815 = vsyncpa [#allocation6], 1 }
 0x25f   :  { %816 = vsyncpa [#allocation4], 1 }

</bundles_post_ra>
